<compile_context>
chip_gen: v6e
topology: v6e:2x2x1
jax: 0.10.0
libtpu: 0.0.40
codegen_flags: <defaults>
</compile_context>

<pallas_src>
import math

import jax
import jax.numpy as jnp
from jax.experimental import pallas as pl
from jax.experimental.pallas import tpu as pltpu

_LANE = 128
_VMEM_BUDGET_BYTES = 2 * 1024 * 1024  # target bytes per pipeline buffer


def _sublane_align(dtype) -> int:
    itemsize = jnp.dtype(dtype).itemsize
    if itemsize >= 4:
        return 8
    if itemsize == 2:
        return 16
    return 32


def _fit_tile(dim: int, align: int, cap: int) -> int:
    """Full dim if it fits under `cap`, else the largest multiple of `align` <= cap."""
    if dim <= cap:
        return dim
    return max(align, (cap // align) * align)


def _shrink_tile(tile: int, dim: int, align: int) -> int:
    """Roughly halve a tile while keeping it a multiple of `align` (or the full dim)."""
    if tile <= align:
        return tile
    new = max(align, ((tile // 2) // align) * align)
    return dim if new >= dim else new


def transpose_pallas(x: jax.Array, dim0: int, dim1: int) -> jax.Array:
    x = jnp.asarray(x)
    nd = x.ndim
    if nd == 0:
        return x
    d0, d1 = sorted((dim0 % nd, dim1 % nd))
    if d0 == d1:
        return x  # transpose(i, i) is a semantic no-op: do not touch HBM

    shape = x.shape
    out_shape = list(shape)
    out_shape[d0], out_shape[d1] = out_shape[d1], out_shape[d0]
    out_shape = tuple(out_shape)

    itemsize = jnp.dtype(x.dtype).itemsize
    sl_align = _sublane_align(x.dtype)
    lane_ax, sub_ax = nd - 1, nd - 2

    # ---- choose per-axis input block sizes (output block = swapped copy) ------
    blk = [1] * nd
    align = [1] * nd
    align[lane_ax] = _LANE
    align[sub_ax] = max(align[sub_ax], sl_align)

    if d1 == lane_ax:
        # Swap touches the lane axis: d0 becomes the output lane axis, so both
        # swapped tiles must be 128-multiples (or the full dim) to stay lane-dense.
        align[d0] = max(align[d0], _LANE)
        blk[lane_ax] = _fit_tile(shape[lane_ax], _LANE, 256)
        blk[d0] = _fit_tile(shape[d0], _LANE, 256)
        if d0 != sub_ax:
            blk[sub_ax] = _fit_tile(shape[sub_ax], sl_align, 64)
        tile_swap = True
    elif d1 == sub_ax:
        # Swap touches the sublane axis: d0 becomes the output sublane axis.
        align[d0] = max(align[d0], sl_align)
        blk[lane_ax] = _fit_tile(shape[lane_ax], _LANE, 512)
        blk[d1] = _fit_tile(shape[d1], sl_align, 128)
        blk[d0] = _fit_tile(shape[d0], sl_align, 128)
        tile_swap = True
    else:
        # Neither swapped axis touches the last two dims: pure DMA relayout; the
        # entire permutation lives in the output index_map (copy kernel body).
        blk[lane_ax] = _fit_tile(shape[lane_ax], _LANE, 512)
        blk[sub_ax] = _fit_tile(shape[sub_ax], sl_align, 512)
        tile_swap = False

    # Trim tiles until one pipeline buffer fits the per-buffer VMEM budget
    # (input + output are each double-buffered -> 4 buffers live).
    shrinkable = set(range(nd))
    while math.prod(blk) * itemsize > _VMEM_BUDGET_BYTES and shrinkable:
        j = max(shrinkable, key=lambda i: blk[i])
        new = _shrink_tile(blk[j], shape[j], align[j])
        if new == blk[j]:
            shrinkable.discard(j)
        else:
            blk[j] = new

    in_block = tuple(blk)
    out_block = list(blk)
    out_block[d0], out_block[d1] = out_block[d1], out_block[d0]
    out_block = tuple(out_block)

    grid = tuple(pl.cdiv(shape[i], blk[i]) for i in range(nd))

    def in_index_map(*g):
        return g

    def out_index_map(*g):
        g = list(g)
        g[d0], g[d1] = g[d1], g[d0]
        return tuple(g)

    if tile_swap:
        def kernel(x_ref, o_ref):
            # Tile-local transpose (XLU work overlaps the DMA; op is mem-bound).
            o_ref[...] = jnp.swapaxes(x_ref[...], d0, d1)
    else:
        def kernel(x_ref, o_ref):
            # Pure streaming copy; permutation handled by out_index_map.
            o_ref[...] = x_ref[...]

    return pl.pallas_call(
        kernel,
        out_shape=jax.ShapeDtypeStruct(out_shape, x.dtype),
        grid=grid,
        in_specs=[pl.BlockSpec(in_block, in_index_map)],
        out_specs=pl.BlockSpec(out_block, out_index_map),
        compiler_params=pltpu.CompilerParams(
            dimension_semantics=("parallel",) * nd,
            vmem_limit_bytes=32 * 1024 * 1024,
        ),
        cost_estimate=pl.CostEstimate(
            flops=0,
            transcendentals=0,
            bytes_accessed=2 * x.size * itemsize,
        ),
    )(x)


class Transpose:
    """Pallas equivalent of gnuoct.models.nn.layers._transpose.Transpose."""

    def __init__(self, *dims):
        self.dims = dims  # no parameters

    def __call__(self, x: jax.Array) -> jax.Array:
        return transpose_pallas(x, *self.dims)


if __name__ == "__main__":
    key = jax.random.PRNGKey(0)
    # Small NCHW-style input: batch=2, channels=4, H=16, W=128 (lane-aligned last dim).
    x = jax.random.normal(key, (2, 4, 16, 128), dtype=jnp.float32)

    # Case 1: swap dims 1 and 2 (sublane-axis swap; in-kernel tile swapaxes).
    y12 = jax.block_until_ready(Transpose(1, 2)(x))
    ref12 = jnp.swapaxes(x, 1, 2)
    assert y12.shape == ref12.shape and y12.dtype == ref12.dtype
    assert jnp.array_equal(y12, ref12)

    # Case 2: swap the last two dims (negative dims, torch convention).
    ymm = jax.block_until_ready(Transpose(-2, -1)(x))
    refmm = jnp.swapaxes(x, -2, -1)
    assert ymm.shape == refmm.shape and ymm.dtype == refmm.dtype
    assert jnp.array_equal(ymm, refmm)

    # Case 3: swap two leading dims (pure DMA relayout via index_map permutation).
    y01 = jax.block_until_ready(Transpose(0, 1)(x))
    ref01 = jnp.swapaxes(x, 0, 1)
    assert y01.shape == ref01.shape and y01.dtype == ref01.dtype
    assert jnp.array_equal(y01, ref01)

    # Case 4: transpose(i, i) no-op returns x directly.
    ynoop = jax.block_until_ready(Transpose(1, 1)(x))
    assert jnp.array_equal(ynoop, x)

    print("KERNEL_OK")
</pallas_src>

<mosaic_0001>
module attributes {stable_mosaic.version = 11 : i64} {
  func.func @kernel(%arg0: i32, %arg1: i32, %arg2: i32, %arg3: i32, %arg4: memref<1x4x16x128xf32, #tpu.memory_space<vmem>>, %arg5: memref<1x16x4x128xf32, #tpu.memory_space<vmem>>) attributes {dimension_semantics = [#tpu.dimension_semantics<parallel>, #tpu.dimension_semantics<parallel>, #tpu.dimension_semantics<parallel>, #tpu.dimension_semantics<parallel>], iteration_bounds = array<i64: 2, 1, 1, 1>, scalar_prefetch = 0 : i64, scratch_operands = 0 : i64, tpu.core_type = #tpu.core_type<tc>, window_params = [{transform_indices = @transform_0, window_bounds = array<i64: 1, 4, 16, 128>}, {transform_indices = @transform_1, window_bounds = array<i64: 1, 16, 4, 128>}]} {
    %c0 = arith.constant 0 : index
    %c0_0 = arith.constant 0 : index
    %c0_1 = arith.constant 0 : index
    %c0_2 = arith.constant 0 : index
    %0 = vector.load %arg4[%c0, %c0_0, %c0_1, %c0_2] : memref<1x4x16x128xf32, #tpu.memory_space<vmem>>, vector<1x4x16x128xf32>
    %1 = tpu.transpose %0, [0, 2, 1, 3] : vector<1x4x16x128xf32> -> vector<1x16x4x128xf32>
    %c0_3 = arith.constant 0 : index
    %c0_4 = arith.constant 0 : index
    %c0_5 = arith.constant 0 : index
    %c0_6 = arith.constant 0 : index
    %2 = vector.load %arg5[%c0_3, %c0_4, %c0_5, %c0_6] : memref<1x16x4x128xf32, #tpu.memory_space<vmem>>, vector<1x16x4x128xf32>
    tpu.vector_store %arg5[%c0_3, %c0_4, %c0_5, %c0_6], %1 {strides = array<i32>} : memref<1x16x4x128xf32, #tpu.memory_space<vmem>>, vector<1x16x4x128xf32>,
    return
  }
  func.func @transform_0(%arg0: i32, %arg1: i32, %arg2: i32, %arg3: i32) -> (i32, i32, i32, i32) {
    %c0_i32 = arith.constant 0 : i32
    return %arg0, %arg1, %arg2, %arg3 : i32, i32, i32, i32
  }
  func.func @transform_1(%arg0: i32, %arg1: i32, %arg2: i32, %arg3: i32) -> (i32, i32, i32, i32) {
    %c0_i32 = arith.constant 0 : i32
    return %arg0, %arg2, %arg1, %arg3 : i32, i32, i32, i32
  }
}

</mosaic_0001>

<bundles_post_ra>
// kernel: tpu_custom_call.1
= control target key start
LH: loop header
LB: loop body
LE: loop exit
PB: predicated region body
PF: predicated region fallthrough
CT: control target
= control target key end

     0   :  { %6 = vsyncpa [#allocation3], 0  ;;  %s850_s0 = inlined_call_operand.hbm [shape: f32[2,4,16,128], index: 0, kind: input, shape index: {}]   ;;  %s851_s1 = inlined_call_operand.hbm [shape: f32[2,16,4,128], index: 1, kind: output, shape index: {}]  }
   0x1   :  { %8 = vsyncpa [#allocation3 + $0x1], 0 }
   0x2   :  { %9 = vsyncpa [#allocation4], 0 }
   0x3   :  { %11 = vsyncpa [#allocation4 + $0x1], 0  ;;  %s681_s6 = smov 0   ;;  %s683_s7 = smov 0  }
   0x4   :  { %s685_s8 = smov 0   ;;  %s687_s9 = smov 0  }
   0x5   :  { %s689_s10 = smov 0   ;;  %s691_s11 = smov 0  }
   0x6 LB: > { %s458_s12 = sadd.s32 4294967295, %s660_s11   ;;  %s459_s13 = sadd.s32 4294967294, %s660_s11   ;;  %s660_s11 = sphi %s691_s11, %s17_s11   ;;  %s656_s10 = sphi %s689_s10, %s862_s10   ;;  %s652_s9 = sphi %s687_s9, %s861_s9   ;;  %s648_s8 = sphi %s685_s8, %s860_s8   ;;  %s644_s7 = sphi %s683_s7, %s859_s7   ;;  %s640_s6 = sphi %s681_s6, %s858_s6  }
   0x7   : > { %s43_s14 = sadd.s32 1, %s656_s10  ;;  %s56_s15 = sadd.s32 1, %s648_s8 }
   0x8   : > { %p45_p0 = scmp.ge.s32.totalorder %s43_s14, 2  ;;  %p63_p1 = scmp.ne.s32.totalorder %s648_s8, %s644_s7 }
   0x9   : > { %p64_p2 = scmp.eq.s32.totalorder %s660_s11, 0  ;;  %p69_p3 = scmp.ne.s32.totalorder %s644_s7, %s640_s6 }
   0xa   : > { %s864_s14 = smov (%p45_p0, %s43_s14), 0  ;;  %p70_p5 = scmp.eq.s32.totalorder %s458_s12, 0 }
   0xb   : > { %p722_p4 = por %p64_p2, %p63_p1  ;;  %s47_s17 = ssub.s32 %s656_s10, %s864_s14 }
   0xc   : > { %p99_p6 = scmp.eq.s32.totalorder %s458_s12, 1  ;;  %p54_p7 = scmp.eq.s32.totalorder %s47_s17, 0 }
   0xd   : > { %p728_p8 = por %p70_p5, %p69_p3  ;;  %p105_p10 = scmp.eq.s32.totalorder %s459_s13, 1 }
   0xe   : > { %p732_p9 = por %p99_p6, %p63_p1  ;;  %p495_p13 = scmp.lt.s32.totalorder %s660_s11, 2 }
   0xf   : > { %s737_s20 = scalar_select %p54_p7, %s648_s8, %s56_s15  }
  0x10   : > { %p739_p11 = por %p105_p10, %p69_p3  ;;  %s125_s22 = sand.u32 1, %s648_s8  }
  0x11   : > { %s462_s23 = sshll.u32 %s125_s22, 6  ;;  %s481_s24 = sshll.u32 %s656_s10, 10 }
  0x12   : > { %s141_s27 = scalar_lea.hbm %s850_s0, %s481_s24  ;;  %s129_s28 = scalar_lea.vmem [#allocation2], %s462_s23 }
  0x13   : > { %s142_s29 = sshll.u32 %s129_s28, 4  ;;  %p752_p0 = pnand %p495_p13, %p722_p4  ;;  %s143_s29 = int_to_ptr.vmem [resolvable:$true] %s142_s29 }
  0x14   : > { %p465_p1 = scmp.ge.s32.totalorder %s660_s11, 1  ;;  %s126_s2 = scalar_lea.sflag [#allocation3], %s125_s22 }
  0x15   : > { %p554_p2 = pneg %p752_p0  ;;  %s565_s3 = scalar_lea.vmem %s143_s29, 1024 }
  0x16   : > { %p566_p3 = scmp.ne.s32.totalorder %s143_s29, %s565_s3  ;;  %s662_s4 = smov [#allocation2]  }
  0x17   : > { %s570_s5 = sshll.u32 %s662_s4, 4  ;;  %s571_s5 = int_to_ptr.vmem [resolvable:$false] %s570_s5 }
  0x18   : > { %p568_p5 = pnand %p566_p3, %p554_p2  ;;  %s572_s12 = scalar_lea.vmem %s571_s5, 2048 }
  0x19   : > { %p573_p7 = scmp.lt.s32.totalorder %s143_s29, %s571_s5  ;;  %p574_p10 = scmp.lt.s32.totalorder %s572_s12, %s565_s3 }
  0x1a   : > { %p569_p6 = pneg %p568_p5 }
  0x1b   : > { %p575_p12 = por %p574_p10, %p573_p7 }
  0x1d   : > { %p576_p4 = pnand %p575_p12, %p569_p6 }
  0x1f   : > { %579 = shalt.err (!%p576_p4)
}
  0x20   : > { %s663_s13 = smov 128   ;;  %s664_s15 = smov 8  }
  0x21   : > { %490 = dma.hbm_to_vmem [thread:$0]  (!%p752_p0), %s141_s27, 1024, %s143_s29, %s126_s2, %s663_s13, %s663_s13, %s664_s15  }
  0x22   : > { %p150_p13 = scmp.lt.s32.totalorder %s660_s11, 3 }
  0x24   : > { %p151_p2 = pnand %p465_p1, %p150_p13 }
  0x25   : > { %s765_s16 = sand.u32 (!%p151_p2), 1, %s644_s7  }
  0x26   : > { %154 = sbr.rel (%p151_p2) target bundleno = 78 (0x4e), region = 24  ;;  %s466_s17 = sshll.u32 (!%p151_p2), %s765_s16, 6 }
  0x27   : > { %s157_s22 = scalar_lea.sflag (!%p151_p2), [#allocation3], %s765_s16  ;;  %s160_s23 = scalar_lea.vmem (!%p151_p2), [#allocation2], %s466_s17 }
  0x2b   : > { %631 = dma.done.wait (%p728_p8), %s157_s22, 1024  }
  0x2c   : > { %633 = vsyncadd (%p728_p8), %s157_s22, 4294966272  ;;  %v195_v0 = vlaneseq  ;;  %v665_v1 = vmov 1983009808   ;;  %v666_v3 = vmov 1934713408   ;;  %v182_v9 = vld [vmem:[%s160_s23] sm:$0xff] }
  0x2d   : > { %v193_v2 = vunpack.c.l.s4 %v665_v1  ;;  %v225_v4 = vunpack.c.l.s4 %v666_v3  ;;  %v184_v10 = vld [vmem:[%s160_s23 + $0x10] sm:$0xff]  ;;  %v186_v11 = vld [vmem:[%s160_s23 + $0x20] sm:$0xff]  ;;  %v183_v15 = vld [vmem:[%s160_s23 + $0x8] sm:$0xff]  ;;  %s777_s18 = scalar_lea.vmem [#allocation5], %s466_s17  ;;  %s482_s24 = sshll.u32 %s652_s9, 10  ;;  %v667_v48 = vmov 0.0  }
  0x2e   : > { %v196_v5 = vshrl.u32 %v195_v0, 7  ;;  %v188_v12 = vld [vmem:[%s160_s23 + $0x30] sm:$0xff]  ;;  %v190_v13 = vcombine.low %v182_v9, %v186_v11  ;;  %v191_v14 = vcombine.high %v182_v9, %v186_v11  ;;  %v185_v16 = vld [vmem:[%s160_s23 + $0x18] sm:$0xff]  ;;  %v187_v20 = vld [vmem:[%s160_s23 + $0x28] sm:$0xff]  ;;  %s360_s25 = sshll.u32 %s777_s18, 4  ;;  %s796_s27 = scalar_lea.hbm %s851_s1, %s482_s24  ;;  %s798_s25 = int_to_ptr.vmem [resolvable:$true] %s360_s25 }
  0x2f   : > { %v194_v6 = vunpack.c.0.s8 %v193_v2  ;;  %v226_v7 = vunpack.c.0.s8 %v225_v4  ;;  %v206_v17 = vcombine.low %v184_v10, %v188_v12  ;;  %v207_v19 = vcombine.high %v184_v10, %v188_v12  ;;  %v189_v21 = vld [vmem:[%s160_s23 + $0x38] sm:$0xff]  ;;  %s343_s28 = scalar_lea.sflag [#allocation4], %s765_s16  ;;  %s580_s29 = scalar_lea.vmem %s798_s25, 1024 }
  0x30   : > { %v258_v24 = vcombine.low %v183_v15, %v187_v20  ;;  %v274_v25 = vcombine.low %v185_v16, %v189_v21  ;;  %v259_v28 = vcombine.high %v183_v15, %v187_v20  ;;  %v275_v29 = vcombine.high %v185_v16, %v189_v21  ;;  %p581_p8 = scmp.ne.s32.totalorder %s798_s25, %s580_s29  ;;  %s668_s30 = smov [#allocation5]  }
  0x31   : > { %v197_v8 = vsub.s32 %v194_v6, %v196_v5  ;;  %v229_v18 = vsub.s32 %v226_v7, %v196_v5  ;;  %s584_s2 = sshll.u32 %s668_s30, 4  ;;  %s585_s2 = int_to_ptr.vmem [resolvable:$false] %s584_s2 }
  0x32   : > { %p582_p12 = pnand %p581_p8, %p732_p9  ;;  %s586_s3 = scalar_lea.vmem %s585_s2, 2048 }
  0x33   : > { %v198_v22 = vrot.slane %v190_v13, %v197_v8  ;;  %v205_v23 = vrot.slane %v191_v14, %v197_v8  ;;  %v214_v26 = vrot.slane %v206_v17, %v197_v8  ;;  %v221_v27 = vrot.slane %v207_v19, %v197_v8  ;;  %p587_p1 = scmp.lt.s32.totalorder %s798_s25, %s585_s2  ;;  %p588_p3 = scmp.lt.s32.totalorder %s586_s3, %s580_s29 }
  0x34   : > { %v266_v30 = vrot.slane %v258_v24, %v197_v8  ;;  %v282_v31 = vrot.slane %v274_v25, %v197_v8  ;;  %v273_v38 = vrot.slane %v259_v28, %v197_v8  ;;  %v289_v39 = vrot.slane %v275_v29, %v197_v8  ;;  %p583_p0 = pneg %p582_p12 }
  0x35   : > { %v222_v32 = vcombine.low %v198_v22, %v214_v26  ;;  %v223_v33 = vcombine.high %v198_v22, %v214_v26  ;;  %v238_v34 = vcombine.low %v205_v23, %v221_v27  ;;  %v239_v35 = vcombine.high %v205_v23, %v221_v27  ;;  %p589_p5 = por %p588_p3, %p587_p1 }
  0x36   : > { %v290_v36 = vcombine.low %v266_v30, %v282_v31  ;;  %v291_v37 = vcombine.high %v266_v30, %v282_v31  ;;  %v306_v46 = vcombine.low %v273_v38, %v289_v39  ;;  %v307_v47 = vcombine.high %v273_v38, %v289_v39 }
  0x37   : > { %468 = vst.sshfl [vmem:[%s777_s18] sm:$0x55 pattern:$0x73516240] %v222_v32  ;;  %v230_v40 = vrot.slane %v222_v32, %v229_v18  ;;  %v237_v41 = vrot.slane %v223_v33, %v229_v18  ;;  %v246_v42 = vrot.slane %v238_v34, %v229_v18  ;;  %v253_v43 = vrot.slane %v239_v35, %v229_v18  ;;  %p590_p6 = pnand %p589_p5, %p583_p0 }
  0x38   : > { %469 = vst.sshfl [vmem:[%s777_s18 + $0x8] sm:$0x55 pattern:$0x73516240] %v223_v33  ;;  %v298_v44 = vrot.slane %v290_v36, %v229_v18  ;;  %v305_v45 = vrot.slane %v291_v37, %v229_v18  ;;  %v314_v55 = vrot.slane %v306_v46, %v229_v18  ;;  %v321_v56 = vrot.slane %v307_v47, %v229_v18 }
  0x39   : > { %470 = vst.sshfl [vmem:[%s777_s18 + $0x10] sm:$0x55 pattern:$0x73516240] %v238_v34  ;;  %v254_v49 = vcombine.high %v230_v40, %v667_v48  ;;  %v255_v50 = vcombine.high %v237_v41, %v667_v48  ;;  %v256_v51 = vcombine.high %v246_v42, %v667_v48  ;;  %v257_v52 = vcombine.high %v253_v43, %v667_v48 }
  0x3a   : > { %471 = vst.sshfl [vmem:[%s777_s18 + $0x18] sm:$0x55 pattern:$0x73516240] %v239_v35  ;;  %v322_v53 = vcombine.high %v298_v44, %v667_v48  ;;  %v323_v54 = vcombine.high %v305_v45, %v667_v48  ;;  %v324_v57 = vcombine.high %v314_v55, %v667_v48  ;;  %v325_v58 = vcombine.high %v321_v56, %v667_v48 }
  0x3b   : > { %472 = vst.sshfl [vmem:[%s777_s18 + $0x20] sm:$0x55 pattern:$0x73516240] %v290_v36  ;;  %327 = vst [vmem:[%s777_s18 + $0x4] sm:$0xf] %v254_v49 }
  0x3c   : > { %473 = vst.sshfl [vmem:[%s777_s18 + $0x28] sm:$0x55 pattern:$0x73516240] %v291_v37  ;;  %329 = vst [vmem:[%s777_s18 + $0xc] sm:$0xf] %v255_v50 }
  0x3d   : > { %474 = vst.sshfl [vmem:[%s777_s18 + $0x30] sm:$0x55 pattern:$0x73516240] %v306_v46  ;;  %331 = vst [vmem:[%s777_s18 + $0x14] sm:$0xf] %v256_v51 }
  0x3e   : > { %475 = vst.sshfl [vmem:[%s777_s18 + $0x38] sm:$0x55 pattern:$0x73516240] %v307_v47  ;;  %333 = vst [vmem:[%s777_s18 + $0x1c] sm:$0xf] %v257_v52 }
  0x3f   : > { %335 = vst [vmem:[%s777_s18 + $0x24] sm:$0xf] %v322_v53  ;;  %337 = vst [vmem:[%s777_s18 + $0x2c] sm:$0xf] %v323_v54 }
  0x40   : > { %339 = vst [vmem:[%s777_s18 + $0x34] sm:$0xf] %v324_v57  ;;  %341 = vst [vmem:[%s777_s18 + $0x3c] sm:$0xf] %v325_v58 }
  0x41   : > { %593 = shalt.err (!%p590_p6)
}
  0x42   : > { %s594_s4 = scalar_lea.hbm %s796_s27, 1024  ;;  %s598_s13 = scalar_lea.hbm %s851_s1, 2048 }
  0x43   : > { %p595_p7 = scmp.ne.s32.totalorder %s796_s27, %s594_s4  ;;  %p599_p13 = scmp.lt.s32.totalorder %s796_s27, %s851_s1 }
  0x44   : > { %p600_p2 = scmp.lt.s32.totalorder %s598_s13, %s594_s4 }
  0x45   : > { %p596_p10 = pnand %p595_p7, %p732_p9 }
  0x46   : > { %p601_p8 = por %p600_p2, %p599_p13 }
  0x47   : > { %p597_p4 = pneg %p596_p10 }
  0x49   : > { %p602_p12 = pnand %p601_p8, %p597_p4 }
  0x4b   : > { %605 = shalt.err (!%p602_p12)
}
  0x4c   : > { %s669_s22 = smov 64   ;;  %s670_s23 = smov 4  }
  0x4d   : > { %485 = dma.vmem_to_hbm [thread:$0]  (%p732_p9), %s798_s25, 1024, %s796_s27, %s343_s28, %s669_s22, %s669_s22, %s670_s23  }
  0x4e PF: > { %s375_s18 = sand.u32 1, %s640_s6   ;;  %p857_p0 = scmp.ge.s32.totalorder %s660_s11, 2 }
  0x4f   : > { %s376_s24 = scalar_lea.sflag [#allocation4], %s375_s18 }
  0x50   : > { %p492_p1 = pnand %p857_p0, %p739_p11 }
  0x52   : > { %p493_p3 = pneg %p492_p1 }
  0x54   : > { %635 = dma.done.wait (%p493_p3), %s376_s24, 1024  }
  0x55   : > { %637 = vsyncadd (%p493_p3), %s376_s24, 4294966272  ;;  %s17_s11 = sadd.s32 1, %s660_s11   ;;  %s858_s6 = smov %s644_s7 }
  0x56   : > { %p14_p5 = scmp.ge.s32.totalorder %s17_s11, 4   ;;  %s859_s7 = smov %s648_s8 }
  0x57   : > { %s860_s8 = smov %s737_s20  ;;  %s861_s9 = smov %s656_s10 }
  0x58   : > { %s862_s10 = smov %s864_s14  ;;  %16 = sbr.rel (!%p14_p5) target bundleno = 6 (0x6), region = 69 }
  0x5d   :  { %381 = vsyncpa [#allocation3], 1 }
  0x5e   :  { %383 = vsyncpa [#allocation3 + $0x1], 1 }
  0x5f   :  { %384 = vsyncpa [#allocation4], 1 }
  0x60   :  { %386 = vsyncpa [#allocation4 + $0x1], 1 }

</bundles_post_ra>
